<compile_context>
chip_gen: v6e
topology: v6e:2x2x1
jax: 0.10.0
libtpu: 0.0.40
codegen_flags: <defaults>
</compile_context>

<pallas_src>
import jax
import jax.numpy as jnp
from jax.experimental import pallas as pl
from jax.experimental.pallas import tpu as pltpu

# ----- small test configuration (consistent with the module's forward) -----
B = 8                   # batch
C, H, W = 4, 16, 16     # image NCHW
SEQ = 8                 # token sequence length
VOCAB = 85              # vocab_size from the module signature
CNN_DIM = 256           # cnn_dim_output   (reduced from 512 for the small test)
TXT_DIM = 256           # text_encoder_dim_output
COMMON = 256            # common_dim
NUM_CLASSES = 8
OUT_PAD = 128           # lane-dense padded classifier width
N_MODALITIES = 2        # n=2 -> fc_fusion input dim = common_dim * 2
BN_EPS = 1e-5
B_TILE = 8              # batch tile (grid axis); weights resident across tiles
ENC_W_ROWS = 8          # enc_img_w padded to a full f32 sublane group

# weight-slab row indices (first axis of the (5, COMMON, COMMON) bf16 slab)
W_ENC_TXT, W_I1, W_T1, W_FI, W_FT = range(5)
# bias-slab row indices (rows of the (7, COMMON) f32 slab)
B_ENC_IMG, B_ENC_TXT, B_I1, B_T1, B_F1, B_F2, B_F3 = range(7)


# --------------------------- Pallas kernel ---------------------------------
def _fused_kernel(pooled_ref, cls_ref, enc_img_w_ref, w_ref, wf2_ref, wf3_ref,
                  b_ref, out_ref):
    f32 = jnp.float32
    bf16 = jnp.bfloat16

    def bias(i, n=COMMON):
        return b_ref[i:i + 1, :n]                     # (1, n) f32, static slice

    # ---- image-encoder stub: pooled -> linear (K=4) -> tanh ----
    # The K=4 contraction is done on the (nearly idle) VPU as 4 broadcast-FMAs
    # instead of an MXU push; tanh goes to the EUP slot.
    # TODO(synk): pretrained CNN image encoder replaced by a GAP+linear+tanh stub.
    pooled = pooled_ref[...]                           # (Bt, C)        f32
    wimg = enc_img_w_ref[...]                          # (8, CNN_DIM)   f32
    acc = pooled[:, 0:1] * wimg[0:1, :]
    for c in range(1, C):                              # static unroll, C=4
        acc = acc + pooled[:, c:c + 1] * wimg[c:c + 1, :]
    img_feat = jnp.tanh(acc + bias(B_ENC_IMG))         # (Bt, CNN_DIM)  f32

    # ---- text-encoder stub: CLS embedding -> linear -> tanh (MXU) ----
    # TODO(synk): pretrained BERT text encoder replaced by embedding + linear + tanh.
    txt_feat = jnp.tanh(
        jnp.dot(cls_ref[...].astype(bf16), w_ref[W_ENC_TXT],
                preferred_element_type=f32) + bias(B_ENC_TXT))   # (Bt, TXT_DIM)

    # ---- projectors, layer 1 + ReLU ----
    pi = jnp.maximum(
        jnp.dot(img_feat.astype(bf16), w_ref[W_I1], preferred_element_type=f32)
        + bias(B_I1), 0.0)
    pt = jnp.maximum(
        jnp.dot(txt_feat.astype(bf16), w_ref[W_T1], preferred_element_type=f32)
        + bias(B_T1), 0.0)

    # ---- projector layer 2  +  fc_fusion layer 1 (BN folded), algebraically
    #      fused offline:  h = relu( pi @ (W_I2@Wf1_img) + pt @ (W_T2@Wf1_txt)
    #                                + (b_I2@Wf1_img + b_T2@Wf1_txt + b_f1') )
    #      (concat(pi2, pt2) @ Wf1 == pi2 @ Wf1[:COMMON] + pt2 @ Wf1[COMMON:]) ----
    h = jnp.maximum(
        jnp.dot(pi.astype(bf16), w_ref[W_FI], preferred_element_type=f32)
        + jnp.dot(pt.astype(bf16), w_ref[W_FT], preferred_element_type=f32)
        + bias(B_F1), 0.0)                             # ReLU; Dropout == identity

    # ---- fc_fusion layer 2 (BN folded into wf2/bf2) + ReLU ----
    h = jnp.maximum(
        jnp.dot(h.astype(bf16), wf2_ref[...], preferred_element_type=f32)
        + bias(B_F2, COMMON // 2), 0.0)

    # ---- final classifier, zero-padded to a lane-dense 128-wide output ----
    out_ref[...] = (jnp.dot(h.astype(bf16), wf3_ref[...],
                            preferred_element_type=f32)
                    + bias(B_F3, OUT_PAD))


def fused_multimodal_head(pooled, cls_emb, params):
    """Encoder stubs + projectors + fusion MLP in a single Pallas kernel."""
    bp = pooled.shape[0]                               # padded batch
    assert bp % B_TILE == 0
    grid = (bp // B_TILE,)
    const2 = lambda i: (0, 0)                          # weight operands: resident
    const3 = lambda i: (0, 0, 0)

    return pl.pallas_call(
        _fused_kernel,
        out_shape=jax.ShapeDtypeStruct((bp, OUT_PAD), jnp.float32),
        grid_spec=pltpu.PrefetchScalarGridSpec(
            num_scalar_prefetch=0,
            grid=grid,
            in_specs=[
                pl.BlockSpec((B_TILE, C), lambda i: (i, 0)),          # pooled
                pl.BlockSpec((B_TILE, TXT_DIM), lambda i: (i, 0)),    # cls_emb
                pl.BlockSpec((ENC_W_ROWS, CNN_DIM), const2),          # enc_img_w
                pl.BlockSpec((5, COMMON, COMMON), const3),            # w_slab
                pl.BlockSpec((COMMON, COMMON // 2), const2),          # wf2
                pl.BlockSpec((COMMON // 2, OUT_PAD), const2),         # wf3
                pl.BlockSpec((7, COMMON), const2),                    # bias slab
            ],
            out_specs=pl.BlockSpec((B_TILE, OUT_PAD), lambda i: (i, 0)),
        ),
        compiler_params=pltpu.CompilerParams(
            dimension_semantics=("parallel",)),        # v7x: shard batch over 2 TCs
    )(pooled, cls_emb, params["enc_img_w"], params["w_slab"],
      params["wf2"], params["wf3"], params["bias"])


# ------------------------- parameter construction --------------------------
def _linear(key, fan_in, fan_out):
    kw, kb = jax.random.split(key)
    w = jax.random.normal(kw, (fan_in, fan_out), jnp.float32) * (1.0 / jnp.sqrt(fan_in))
    b = jax.random.normal(kb, (1, fan_out), jnp.float32) * 0.01
    return w, b


def _folded_bn(key, dim):
    kg, kb, km, kv = jax.random.split(key, 4)
    gamma = 1.0 + 0.1 * jax.random.normal(kg, (1, dim), jnp.float32)
    beta = 0.1 * jax.random.normal(kb, (1, dim), jnp.float32)
    running_mean = 0.1 * jax.random.normal(km, (1, dim), jnp.float32)
    running_var = jnp.abs(jax.random.normal(kv, (1, dim), jnp.float32)) + 0.5
    scale = gamma / jnp.sqrt(running_var + BN_EPS)
    shift = beta - running_mean * scale
    return scale, shift


def make_params(key):
    keys = jax.random.split(key, 12)
    # image_projector: Linear(CNN_DIM, COMMON) -> ReLU -> Linear(COMMON, COMMON)
    wi1, bi1 = _linear(keys[0], CNN_DIM, COMMON)
    wi2, bi2 = _linear(keys[1], COMMON, COMMON)
    # text_projector: Linear(TXT_DIM, COMMON) -> ReLU -> Linear(COMMON, COMMON)
    wt1, bt1 = _linear(keys[2], TXT_DIM, COMMON)
    wt2, bt2 = _linear(keys[3], COMMON, COMMON)
    # fc_fusion layer 1: Linear(COMMON * 2, COMMON) + BatchNorm1d (eval)
    wf1, bf1 = _linear(keys[4], COMMON * N_MODALITIES, COMMON)
    s1, h1 = _folded_bn(keys[5], COMMON)
    # fc_fusion layer 2: Linear(COMMON, COMMON // 2) + BatchNorm1d (eval)
    wf2, bf2 = _linear(keys[6], COMMON, COMMON // 2)
    s2, h2 = _folded_bn(keys[7], COMMON // 2)
    # fc_fusion output: Linear(COMMON // 2, NUM_CLASSES)
    wf3, bf3 = _linear(keys[8], COMMON // 2, NUM_CLASSES)
    # ----- encoder stubs (deterministic, in-script) -----
    # TODO(synk): pretrained CNN image encoder (ResNet etc.) replaced by a
    # global-average-pool + linear + tanh stub producing CNN_DIM features.
    enc_img_w, enc_img_b = _linear(keys[9], C, CNN_DIM)
    # TODO(synk): pretrained BERT text encoder replaced by an embedding table;
    # "last_hidden_state[:, 0, :]" is emulated by the CLS-position embedding.
    emb = jax.random.normal(keys[10], (VOCAB, TXT_DIM), jnp.float32) * 0.02
    enc_txt_w, enc_txt_b = _linear(keys[11], TXT_DIM, TXT_DIM)

    # --- fold eval-mode BatchNorm into the fc_fusion weights/biases (f32) ---
    #     (x @ W + b) * s + sh  ==  x @ (W * s) + (b * s + sh)
    wf1_img = wf1[:COMMON, :] * s1          # split along the concat axis
    wf1_txt = wf1[COMMON:, :] * s1
    bf1_f = bf1 * s1 + h1
    wf2_f = wf2 * s2
    bf2_f = bf2 * s2 + h2

    # --- fold projector layer-2 linears into fc_fusion layer-1 (f32, then bf16):
    #     (pi1 @ W_I2 + b_I2) @ Wf1_img  ==  pi1 @ (W_I2 @ Wf1_img) + b_I2 @ Wf1_img
    w_fi = wi2 @ wf1_img                    # (COMMON, COMMON) f32
    w_ft = wt2 @ wf1_txt                    # (COMMON, COMMON) f32
    bf1_all = bf1_f + bi2 @ wf1_img + bt2 @ wf1_txt

    # --- zero-pad the classifier to a lane-dense 128-wide output ---
    wf3_pad = jnp.zeros((COMMON // 2, OUT_PAD), jnp.float32).at[:, :NUM_CLASSES].set(wf3)
    bf3_pad = jnp.zeros((1, OUT_PAD), jnp.float32).at[:, :NUM_CLASSES].set(bf3)

    # padded bias-slab rows must fit within COMMON lanes
    assert COMMON // 2 <= COMMON and OUT_PAD <= COMMON

    bf16 = jnp.bfloat16
    # single bf16 weight slab (5, COMMON, COMMON) — one DMA for ~0.66 MB of weights
    # TODO(synk): optionally int8-quantize this slab on v5e/v6e (not v7x: fp8-only MXU).
    w_slab = jnp.stack([enc_txt_w, wi1, wt1, w_fi, w_ft], axis=0).astype(bf16)

    def pad_row(b):
        return jnp.zeros((1, COMMON), jnp.float32).at[:, :b.shape[1]].set(b)

    # single f32 bias slab (7, COMMON) — keeps all VPU adds in f32 (v5e-friendly)
    bias_slab = jnp.concatenate(
        [enc_img_b, enc_txt_b, bi1, bt1, bf1_all,
         pad_row(bf2_f), pad_row(bf3_pad)], axis=0)

    # enc_img_w used on the VPU in f32; pad to a full (8, CNN_DIM) sublane group
    enc_img_w_pad = jnp.zeros((ENC_W_ROWS, CNN_DIM), jnp.float32).at[:C, :].set(enc_img_w)

    return {
        "emb": emb,                              # stays f32 (wrapper gather)
        "enc_img_w": enc_img_w_pad,              # (8, CNN_DIM)          f32
        "w_slab": w_slab,                        # (5, COMMON, COMMON)   bf16
        "wf2": wf2_f.astype(bf16),               # (COMMON, COMMON//2)   bf16
        "wf3": wf3_pad.astype(bf16),             # (COMMON//2, OUT_PAD)  bf16
        "bias": bias_slab,                       # (7, COMMON)           f32
    }


# --------------------------- full forward pass ------------------------------
@jax.jit
def multimodal_forward(image, input_ids, attention_mask, params):
    # image encoder stub prologue: NCHW -> global average pool over H, W
    pooled = jnp.mean(image, axis=(2, 3))                            # (B, C)

    # metadata['input_ids'].squeeze(1) / attention_mask.squeeze(1)
    ids = jnp.squeeze(input_ids, axis=1)                             # (B, SEQ)
    mask = jnp.squeeze(attention_mask, axis=1).astype(jnp.float32)   # (B, SEQ)
    # BERT path: hidden state at position 0 (CLS); stubbed via embedding lookup.
    cls_emb = params["emb"][ids[:, 0]] * mask[:, 0:1]                # (B, TXT_DIM)

    # pad batch to a multiple of the batch tile (static Python int)
    b = pooled.shape[0]
    pad = (-b) % B_TILE
    if pad:
        pooled = jnp.pad(pooled, ((0, pad), (0, 0)))
        cls_emb = jnp.pad(cls_emb, ((0, pad), (0, 0)))

    # everything else (encoder linears + projectors + fc_fusion) in one Pallas call
    out_pad = fused_multimodal_head(pooled, cls_emb, params)         # (Bp, OUT_PAD)
    return out_pad[:b, :NUM_CLASSES]


if __name__ == "__main__":
    key = jax.random.PRNGKey(0)
    k_img, k_ids, k_par = jax.random.split(key, 3)

    image = jax.random.normal(k_img, (B, C, H, W), jnp.float32)          # NCHW
    input_ids = jax.random.randint(k_ids, (B, 1, SEQ), 0, VOCAB, jnp.int32)
    attention_mask = jnp.ones((B, 1, SEQ), jnp.int32)

    params = make_params(k_par)

    out = multimodal_forward(image, input_ids, attention_mask, params)
    out = jax.block_until_ready(out)

    assert out.shape == (B, NUM_CLASSES), out.shape
    assert bool(jnp.isfinite(out).all()), "non-finite output"
    print("KERNEL_OK")
</pallas_src>

<mosaic_0001>
module attributes {stable_mosaic.version = 11 : i64} {
  func.func @_fused_kernel(%arg0: i32, %arg1: memref<8x4xf32, #tpu.memory_space<vmem>>, %arg2: memref<8x256xf32, #tpu.memory_space<vmem>>, %arg3: memref<8x256xf32, #tpu.memory_space<vmem>>, %arg4: memref<5x256x256xbf16, #tpu.memory_space<vmem>>, %arg5: memref<256x128xbf16, #tpu.memory_space<vmem>>, %arg6: memref<128x128xbf16, #tpu.memory_space<vmem>>, %arg7: memref<7x256xf32, #tpu.memory_space<vmem>>, %arg8: memref<8x128xf32, #tpu.memory_space<vmem>>) attributes {dimension_semantics = [#tpu.dimension_semantics<parallel>], iteration_bounds = array<i64: 1>, scalar_prefetch = 0 : i64, scratch_operands = 0 : i64, tpu.core_type = #tpu.core_type<tc>, window_params = [{transform_indices = @transform_0, window_bounds = array<i64: 8, 4>}, {transform_indices = @transform_1, window_bounds = array<i64: 8, 256>}, {pipeline_mode = #tpu.pipeline_mode<synchronous>, transform_indices = @transform_2, window_bounds = array<i64: 8, 256>}, {pipeline_mode = #tpu.pipeline_mode<synchronous>, transform_indices = @transform_3, window_bounds = array<i64: 5, 256, 256>}, {pipeline_mode = #tpu.pipeline_mode<synchronous>, transform_indices = @transform_4, window_bounds = array<i64: 256, 128>}, {pipeline_mode = #tpu.pipeline_mode<synchronous>, transform_indices = @transform_5, window_bounds = array<i64: 128, 128>}, {pipeline_mode = #tpu.pipeline_mode<synchronous>, transform_indices = @transform_6, window_bounds = array<i64: 7, 256>}, {transform_indices = @transform_7, window_bounds = array<i64: 8, 128>}]} {
    %c0 = arith.constant 0 : index
    %c0_0 = arith.constant 0 : index
    %0 = vector.load %arg1[%c0, %c0_0] : memref<8x4xf32, #tpu.memory_space<vmem>>, vector<8x4xf32>
    %c0_1 = arith.constant 0 : index
    %c0_2 = arith.constant 0 : index
    %1 = vector.load %arg3[%c0_1, %c0_2] : memref<8x256xf32, #tpu.memory_space<vmem>>, vector<8x256xf32>
    %2 = vector.extract_strided_slice %0 {offsets = [0, 0], sizes = [8, 1], strides = [1, 1]} : vector<8x4xf32> to vector<8x1xf32>
    %3 = vector.extract_strided_slice %1 {offsets = [0, 0], sizes = [1, 256], strides = [1, 1]} : vector<8x256xf32> to vector<1x256xf32>
    %4 = vector.broadcast %2 : vector<8x1xf32> to vector<8x256xf32>
    %5 = vector.broadcast %3 : vector<1x256xf32> to vector<8x256xf32>
    %6 = arith.mulf %4, %5 : vector<8x256xf32>
    %7 = vector.extract_strided_slice %0 {offsets = [0, 1], sizes = [8, 1], strides = [1, 1]} : vector<8x4xf32> to vector<8x1xf32>
    %8 = vector.extract_strided_slice %1 {offsets = [1, 0], sizes = [1, 256], strides = [1, 1]} : vector<8x256xf32> to vector<1x256xf32>
    %9 = vector.broadcast %7 : vector<8x1xf32> to vector<8x256xf32>
    %10 = vector.broadcast %8 : vector<1x256xf32> to vector<8x256xf32>
    %11 = arith.mulf %9, %10 : vector<8x256xf32>
    %12 = arith.addf %6, %11 : vector<8x256xf32>
    %13 = vector.extract_strided_slice %0 {offsets = [0, 2], sizes = [8, 1], strides = [1, 1]} : vector<8x4xf32> to vector<8x1xf32>
    %14 = vector.extract_strided_slice %1 {offsets = [2, 0], sizes = [1, 256], strides = [1, 1]} : vector<8x256xf32> to vector<1x256xf32>
    %15 = vector.broadcast %13 : vector<8x1xf32> to vector<8x256xf32>
    %16 = vector.broadcast %14 : vector<1x256xf32> to vector<8x256xf32>
    %17 = arith.mulf %15, %16 : vector<8x256xf32>
    %18 = arith.addf %12, %17 : vector<8x256xf32>
    %19 = vector.extract_strided_slice %0 {offsets = [0, 3], sizes = [8, 1], strides = [1, 1]} : vector<8x4xf32> to vector<8x1xf32>
    %20 = vector.extract_strided_slice %1 {offsets = [3, 0], sizes = [1, 256], strides = [1, 1]} : vector<8x256xf32> to vector<1x256xf32>
    %21 = vector.broadcast %19 : vector<8x1xf32> to vector<8x256xf32>
    %22 = vector.broadcast %20 : vector<1x256xf32> to vector<8x256xf32>
    %23 = arith.mulf %21, %22 : vector<8x256xf32>
    %24 = arith.addf %18, %23 : vector<8x256xf32>
    %c0_3 = arith.constant 0 : index
    %c0_4 = arith.constant 0 : index
    %25 = vector.load %arg7[%c0_3, %c0_4] : memref<7x256xf32, #tpu.memory_space<vmem>>, vector<1x256xf32>
    %26 = vector.broadcast %25 : vector<1x256xf32> to vector<8x256xf32>
    %27 = arith.addf %24, %26 : vector<8x256xf32>
    %28 = math.tanh %27 : vector<8x256xf32>
    %c0_5 = arith.constant 0 : index
    %c0_6 = arith.constant 0 : index
    %29 = vector.load %arg2[%c0_5, %c0_6] : memref<8x256xf32, #tpu.memory_space<vmem>>, vector<8x256xf32>
    %30 = arith.truncf %29 : vector<8x256xf32> to vector<8x256xbf16>
    %c0_7 = arith.constant 0 : index
    %c0_8 = arith.constant 0 : index
    %c0_9 = arith.constant 0 : index
    %31 = vector.load %arg4[%c0_7, %c0_8, %c0_9] : memref<5x256x256xbf16, #tpu.memory_space<vmem>>, vector<1x256x256xbf16>
    %32 = vector.shape_cast %31 : vector<1x256x256xbf16> to vector<256x256xbf16>
    %cst = arith.constant dense<0.000000e+00> : vector<8x256xf32>
    %33 = tpu.matmul %30, %32, %cst {dimension_numbers = #tpu.dot_dimension_numbers<[1], [0], [0], [1], [0, 0, 1, 1], [], []>} : vector<8x256xbf16>, vector<256x256xbf16>, vector<8x256xf32> -> vector<8x256xf32>
    %c1 = arith.constant 1 : index
    %c0_10 = arith.constant 0 : index
    %34 = vector.load %arg7[%c1, %c0_10] : memref<7x256xf32, #tpu.memory_space<vmem>>, vector<1x256xf32>
    %35 = vector.broadcast %34 : vector<1x256xf32> to vector<8x256xf32>
    %36 = arith.addf %33, %35 : vector<8x256xf32>
    %37 = math.tanh %36 : vector<8x256xf32>
    %38 = arith.truncf %28 : vector<8x256xf32> to vector<8x256xbf16>
    %c1_11 = arith.constant 1 : index
    %c0_12 = arith.constant 0 : index
    %c0_13 = arith.constant 0 : index
    %39 = vector.load %arg4[%c1_11, %c0_12, %c0_13] : memref<5x256x256xbf16, #tpu.memory_space<vmem>>, vector<1x256x256xbf16>
    %40 = vector.shape_cast %39 : vector<1x256x256xbf16> to vector<256x256xbf16>
    %cst_14 = arith.constant dense<0.000000e+00> : vector<8x256xf32>
    %41 = tpu.matmul %38, %40, %cst_14 {dimension_numbers = #tpu.dot_dimension_numbers<[1], [0], [0], [1], [0, 0, 1, 1], [], []>} : vector<8x256xbf16>, vector<256x256xbf16>, vector<8x256xf32> -> vector<8x256xf32>
    %c2 = arith.constant 2 : index
    %c0_15 = arith.constant 0 : index
    %42 = vector.load %arg7[%c2, %c0_15] : memref<7x256xf32, #tpu.memory_space<vmem>>, vector<1x256xf32>
    %43 = vector.broadcast %42 : vector<1x256xf32> to vector<8x256xf32>
    %44 = arith.addf %41, %43 : vector<8x256xf32>
    %cst_16 = arith.constant 0.000000e+00 : f32
    %45 = vector.broadcast %cst_16 : f32 to vector<8x256xf32>
    %46 = arith.maximumf %44, %45 : vector<8x256xf32>
    %47 = arith.truncf %37 : vector<8x256xf32> to vector<8x256xbf16>
    %c2_17 = arith.constant 2 : index
    %c0_18 = arith.constant 0 : index
    %c0_19 = arith.constant 0 : index
    %48 = vector.load %arg4[%c2_17, %c0_18, %c0_19] : memref<5x256x256xbf16, #tpu.memory_space<vmem>>, vector<1x256x256xbf16>
    %49 = vector.shape_cast %48 : vector<1x256x256xbf16> to vector<256x256xbf16>
    %cst_20 = arith.constant dense<0.000000e+00> : vector<8x256xf32>
    %50 = tpu.matmul %47, %49, %cst_20 {dimension_numbers = #tpu.dot_dimension_numbers<[1], [0], [0], [1], [0, 0, 1, 1], [], []>} : vector<8x256xbf16>, vector<256x256xbf16>, vector<8x256xf32> -> vector<8x256xf32>
    %c3 = arith.constant 3 : index
    %c0_21 = arith.constant 0 : index
    %51 = vector.load %arg7[%c3, %c0_21] : memref<7x256xf32, #tpu.memory_space<vmem>>, vector<1x256xf32>
    %52 = vector.broadcast %51 : vector<1x256xf32> to vector<8x256xf32>
    %53 = arith.addf %50, %52 : vector<8x256xf32>
    %cst_22 = arith.constant 0.000000e+00 : f32
    %54 = vector.broadcast %cst_22 : f32 to vector<8x256xf32>
    %55 = arith.maximumf %53, %54 : vector<8x256xf32>
    %56 = arith.truncf %46 : vector<8x256xf32> to vector<8x256xbf16>
    %c3_23 = arith.constant 3 : index
    %c0_24 = arith.constant 0 : index
    %c0_25 = arith.constant 0 : index
    %57 = vector.load %arg4[%c3_23, %c0_24, %c0_25] : memref<5x256x256xbf16, #tpu.memory_space<vmem>>, vector<1x256x256xbf16>
    %58 = vector.shape_cast %57 : vector<1x256x256xbf16> to vector<256x256xbf16>
    %cst_26 = arith.constant dense<0.000000e+00> : vector<8x256xf32>
    %59 = tpu.matmul %56, %58, %cst_26 {dimension_numbers = #tpu.dot_dimension_numbers<[1], [0], [0], [1], [0, 0, 1, 1], [], []>} : vector<8x256xbf16>, vector<256x256xbf16>, vector<8x256xf32> -> vector<8x256xf32>
    %60 = arith.truncf %55 : vector<8x256xf32> to vector<8x256xbf16>
    %c4 = arith.constant 4 : index
    %c0_27 = arith.constant 0 : index
    %c0_28 = arith.constant 0 : index
    %61 = vector.load %arg4[%c4, %c0_27, %c0_28] : memref<5x256x256xbf16, #tpu.memory_space<vmem>>, vector<1x256x256xbf16>
    %62 = vector.shape_cast %61 : vector<1x256x256xbf16> to vector<256x256xbf16>
    %cst_29 = arith.constant dense<0.000000e+00> : vector<8x256xf32>
    %63 = tpu.matmul %60, %62, %cst_29 {dimension_numbers = #tpu.dot_dimension_numbers<[1], [0], [0], [1], [0, 0, 1, 1], [], []>} : vector<8x256xbf16>, vector<256x256xbf16>, vector<8x256xf32> -> vector<8x256xf32>
    %64 = arith.addf %59, %63 : vector<8x256xf32>
    %c4_30 = arith.constant 4 : index
    %c0_31 = arith.constant 0 : index
    %65 = vector.load %arg7[%c4_30, %c0_31] : memref<7x256xf32, #tpu.memory_space<vmem>>, vector<1x256xf32>
    %66 = vector.broadcast %65 : vector<1x256xf32> to vector<8x256xf32>
    %67 = arith.addf %64, %66 : vector<8x256xf32>
    %cst_32 = arith.constant 0.000000e+00 : f32
    %68 = vector.broadcast %cst_32 : f32 to vector<8x256xf32>
    %69 = arith.maximumf %67, %68 : vector<8x256xf32>
    %70 = arith.truncf %69 : vector<8x256xf32> to vector<8x256xbf16>
    %c0_33 = arith.constant 0 : index
    %c0_34 = arith.constant 0 : index
    %71 = vector.load %arg5[%c0_33, %c0_34] : memref<256x128xbf16, #tpu.memory_space<vmem>>, vector<256x128xbf16>
    %cst_35 = arith.constant dense<0.000000e+00> : vector<8x128xf32>
    %72 = tpu.matmul %70, %71, %cst_35 {dimension_numbers = #tpu.dot_dimension_numbers<[1], [0], [0], [1], [0, 0, 1, 1], [], []>} : vector<8x256xbf16>, vector<256x128xbf16>, vector<8x128xf32> -> vector<8x128xf32>
    %c5 = arith.constant 5 : index
    %c0_36 = arith.constant 0 : index
    %73 = vector.load %arg7[%c5, %c0_36] : memref<7x256xf32, #tpu.memory_space<vmem>>, vector<1x128xf32>
    %74 = vector.broadcast %73 : vector<1x128xf32> to vector<8x128xf32>
    %75 = arith.addf %72, %74 : vector<8x128xf32>
    %cst_37 = arith.constant 0.000000e+00 : f32
    %76 = vector.broadcast %cst_37 : f32 to vector<8x128xf32>
    %77 = arith.maximumf %75, %76 : vector<8x128xf32>
    %78 = arith.truncf %77 : vector<8x128xf32> to vector<8x128xbf16>
    %c0_38 = arith.constant 0 : index
    %c0_39 = arith.constant 0 : index
    %79 = vector.load %arg6[%c0_38, %c0_39] : memref<128x128xbf16, #tpu.memory_space<vmem>>, vector<128x128xbf16>
    %cst_40 = arith.constant dense<0.000000e+00> : vector<8x128xf32>
    %80 = tpu.matmul %78, %79, %cst_40 {dimension_numbers = #tpu.dot_dimension_numbers<[1], [0], [0], [1], [0, 0, 1, 1], [], []>} : vector<8x128xbf16>, vector<128x128xbf16>, vector<8x128xf32> -> vector<8x128xf32>
    %c6 = arith.constant 6 : index
    %c0_41 = arith.constant 0 : index
    %81 = vector.load %arg7[%c6, %c0_41] : memref<7x256xf32, #tpu.memory_space<vmem>>, vector<1x128xf32>
    %82 = vector.broadcast %81 : vector<1x128xf32> to vector<8x128xf32>
    %83 = arith.addf %80, %82 : vector<8x128xf32>
    %c0_42 = arith.constant 0 : index
    %c0_43 = arith.constant 0 : index
    %84 = vector.load %arg8[%c0_42, %c0_43] : memref<8x128xf32, #tpu.memory_space<vmem>>, vector<8x128xf32>
    tpu.vector_store %arg8[%c0_42, %c0_43], %83 {strides = array<i32>} : memref<8x128xf32, #tpu.memory_space<vmem>>, vector<8x128xf32>,
    return
  }
  func.func @transform_0(%arg0: i32) -> (i32, i32) {
    %c0_i32 = arith.constant 0 : i32
    %c0_i32_0 = arith.constant 0 : i32
    return %arg0, %c0_i32 : i32, i32
  }
  func.func @transform_1(%arg0: i32) -> (i32, i32) {
    %c0_i32 = arith.constant 0 : i32
    %c0_i32_0 = arith.constant 0 : i32
    return %arg0, %c0_i32 : i32, i32
  }
  func.func @transform_2(%arg0: i32) -> (i32, i32) {
    %c0_i32 = arith.constant 0 : i32
    %c0_i32_0 = arith.constant 0 : i32
    %c0_i32_1 = arith.constant 0 : i32
    return %c0_i32, %c0_i32_0 : i32, i32
  }
  func.func @transform_3(%arg0: i32) -> (i32, i32, i32) {
    %c0_i32 = arith.constant 0 : i32
    %c0_i32_0 = arith.constant 0 : i32
    %c0_i32_1 = arith.constant 0 : i32
    %c0_i32_2 = arith.constant 0 : i32
    return %c0_i32, %c0_i32_0, %c0_i32_1 : i32, i32, i32
  }
  func.func @transform_4(%arg0: i32) -> (i32, i32) {
    %c0_i32 = arith.constant 0 : i32
    %c0_i32_0 = arith.constant 0 : i32
    %c0_i32_1 = arith.constant 0 : i32
    return %c0_i32, %c0_i32_0 : i32, i32
  }
  func.func @transform_5(%arg0: i32) -> (i32, i32) {
    %c0_i32 = arith.constant 0 : i32
    %c0_i32_0 = arith.constant 0 : i32
    %c0_i32_1 = arith.constant 0 : i32
    return %c0_i32, %c0_i32_0 : i32, i32
  }
  func.func @transform_6(%arg0: i32) -> (i32, i32) {
    %c0_i32 = arith.constant 0 : i32
    %c0_i32_0 = arith.constant 0 : i32
    %c0_i32_1 = arith.constant 0 : i32
    return %c0_i32, %c0_i32_0 : i32, i32
  }
  func.func @transform_7(%arg0: i32) -> (i32, i32) {
    %c0_i32 = arith.constant 0 : i32
    %c0_i32_0 = arith.constant 0 : i32
    return %arg0, %c0_i32 : i32, i32
  }
}

</mosaic_0001>

<bundles_post_ra>
// kernel: multimodal_forward.1
= control target key start
LH: loop header
LB: loop body
LE: loop exit
PB: predicated region body
PF: predicated region fallthrough
CT: control target
= control target key end

     0   :  { %12 = vsyncpa [#allocation3], 0  ;;  %s2413_s0 = inlined_call_operand.vmem [shape: f32[8,4], index: 0, kind: input, shape index: {}]   ;;  %s2414_s1 = inlined_call_operand.vmem [shape: f32[8,256], index: 1, kind: input, shape index: {}]   ;;  %s2415_s2 = inlined_call_operand.vmem [shape: f32[8,256], index: 2, kind: input, shape index: {}]   ;;  %s2416_s3 = inlined_call_operand.hbm [shape: bf16[5,256,256], index: 3, kind: input, shape index: {}]   ;;  %s2417_s4 = inlined_call_operand.vmem [shape: bf16[256,128], index: 4, kind: input, shape index: {}]   ;;  %s2418_s5 = inlined_call_operand.vmem [shape: bf16[128,128], index: 5, kind: input, shape index: {}]   ;;  %s2419_s6 = inlined_call_operand.vmem [shape: f32[7,256], index: 6, kind: input, shape index: {}]   ;;  %s2420_s7 = inlined_call_operand.hbm [shape: f32[8,128], index: 7, kind: output, shape index: {}]  }
   0x1   :  { %13 = vsyncpa [#allocation4], 0  ;;  %s2231_s24 = smov [#allocation2]  }
   0x2   :  { %s25_s25 = sshll.u32 %s2231_s24, 4  ;;  %s26_s25 = int_to_ptr.vmem [resolvable:$true] %s25_s25 }
   0x3   :  { %s2195_s26 = scalar_lea.vmem %s26_s25, 20480  ;;  %p2200_p1 = scmp.lt.s32.totalorder %s26_s25, %s26_s25 }
   0x4   :  { %p2196_p0 = scmp.ne.s32.totalorder %s26_s25, %s2195_s26  ;;  %p2201_p2 = scmp.lt.s32.totalorder %s2195_s26, %s2195_s26 }
   0x6   :  { %p2202_p3 = por %p2201_p2, %p2200_p1 }
   0x8   :  { %p2203_p4 = pnand %p2202_p3, %p2196_p0 }
   0xa   :  { %2206 = shalt.err (!%p2203_p4)
}
   0xb   :  { %s2232_s27 = smov 128   ;;  %s2233_s28 = smov 8  }
   0xc   :  { %31 = dma.hbm_to_vmem [thread:$0]  %s2416_s3, 20480, %s26_s25, [#allocation3], %s2232_s27, %s2232_s27, %s2233_s28  }
   0xd   :  { %2227 = dma.done.wait [#allocation3], 20480  }
   0xe   :  { %2228 = vsyncadd [#allocation3], 4294946816  ;;  %v2234_v0 = vmov 0   ;;  %v2235_v1 = vmov 2   ;;  %v1915_v2 = vld [vmem:[#allocation2 + $0x74] ss:$8 sps:$4 sm:$0xff]  }
   0xf   :  { %1910 = vset.pattern.permute.xlu0 %v2234_v0  ;;  %1912 = vset.pattern.permute.xlu1 %v2235_v1  ;;  %v1917_v3 = vld [vmem:[#allocation2 + $0x70] ss:$8 sps:$4 sm:$0xff]   ;;  %v1918_v4 = vld [vmem:[#allocation2 + $0x64] ss:$8 sps:$4 sm:$0xff]   ;;  %v1920_v5 = vld [vmem:[#allocation2 + $0x60] ss:$8 sps:$4 sm:$0xff]  }
  0x10   :  { %333 = vmatprep.subr.bf16.mxu0 %v1915_v2  ;;  %v1921_v6 = vld [vmem:[#allocation2 + $0x54] ss:$8 sps:$4 sm:$0xff]   ;;  %v1923_v7 = vld [vmem:[#allocation2 + $0x50] ss:$8 sps:$4 sm:$0xff]   ;;  %v1924_v8 = vld [vmem:[#allocation2 + $0x44] ss:$8 sps:$4 sm:$0xff]  }
  0x11   :  { %334 = vmatpush1.bf16.msra.mxu0 %v1917_v3  ;;  %v1926_v9 = vld [vmem:[#allocation2 + $0x40] ss:$8 sps:$4 sm:$0xff]   ;;  %v1927_v10 = vld [vmem:[#allocation2 + $0x34] ss:$8 sps:$4 sm:$0xff]   ;;  %v1929_v11 = vld [vmem:[#allocation2 + $0x30] ss:$8 sps:$4 sm:$0xff]  }
  0x12   :  { %335 = vmatprep.subr.bf16.mxu0 %v1918_v4  ;;  %v1930_v12 = vld [vmem:[#allocation2 + $0x24] ss:$8 sps:$4 sm:$0xff]   ;;  %v1932_v13 = vld [vmem:[#allocation2 + $0x20] ss:$8 sps:$4 sm:$0xff]   ;;  %v1933_v14 = vld [vmem:[#allocation2 + $0x14] ss:$8 sps:$4 sm:$0xff]  }
  0x13   :  { %v1935_v15 = vld [vmem:[#allocation2 + $0x10] ss:$8 sps:$4 sm:$0xff]   ;;  %v125_v16 = vld [vmem:[%s2414_s1 + $0x8] sm:$0xff]  ;;  %v42_v18 = vld [vmem:[%s2413_s0] sm:$0xff]  ;;  %v2236_v25 = vmov 1   ;;  %v2237_v28 = vmov 3  }
  0x14   :  { %v127_v17 = vpack.c.bf16 %v125_v16, %v125_v16  ;;  %47 = vperm.xlu0 %1910, %v42_v18   ;;  %v1963_v19 = vld [vmem:[#allocation2 + $0x174] ss:$8 sps:$4 sm:$0xff]   ;;  %v1965_v20 = vld [vmem:[#allocation2 + $0x170] ss:$8 sps:$4 sm:$0xff]   ;;  %v1936_v21 = vld [vmem:[#allocation2 + $0x4] ss:$8 sps:$4 sm:$0xff]   ;;  %77 = vperm.xlu1 %1912, %v42_v18  }
  0x15   :  { %336 = vmatpush1.bf16.msra.mxu0 %v1920_v5  ;;  %584 = vmatprep.subr.bf16.mxu1 %v1963_v19  ;;  %v1966_v22 = vld [vmem:[#allocation2 + $0x164] ss:$8 sps:$4 sm:$0xff]   ;;  %v1968_v23 = vld [vmem:[#allocation2 + $0x160] ss:$8 sps:$4 sm:$0xff]   ;;  %v1969_v26 = vld [vmem:[#allocation2 + $0x154] ss:$8 sps:$4 sm:$0xff]  }
  0x16   :  { %337 = vmatprep.subr.bf16.mxu0 %v1921_v6  ;;  %365 = vmatprep.mubr.bf16.mxu0 %v127_v17  ;;  %v1938_v24 = vld [vmem:[#allocation2] ss:$8 sps:$4 sm:$0xff]   ;;  %v1939_v27 = vld [vmem:[#allocation2 + $0xf4] ss:$8 sps:$4 sm:$0xff]   ;;  %v1971_v29 = vld [vmem:[#allocation2 + $0x150] ss:$8 sps:$4 sm:$0xff]  }
  0x17   :  { %585 = vmatpush1.bf16.msra.mxu1 %v1965_v20  ;;  %v1941_v30 = vld [vmem:[#allocation2 + $0xf0] ss:$8 sps:$4 sm:$0xff]   ;;  %v1972_v31 = vld [vmem:[#allocation2 + $0x144] ss:$8 sps:$4 sm:$0xff]   ;;  %v1974_v33 = vld [vmem:[#allocation2 + $0x140] ss:$8 sps:$4 sm:$0xff]  }
  0x18   :  { %1911 = vset.pattern.permute.xlu0 %v2236_v25  ;;  %1913 = vset.pattern.permute.xlu1 %v2237_v28  ;;  %v1942_v32 = vld [vmem:[#allocation2 + $0xe4] ss:$8 sps:$4 sm:$0xff]   ;;  %v1944_v34 = vld [vmem:[#allocation2 + $0xe0] ss:$8 sps:$4 sm:$0xff]   ;;  %v1978_v35 = vld [vmem:[#allocation2 + $0x134] ss:$8 sps:$4 sm:$0xff]  }
  0x19   :  { %338 = vmatpush1.bf16.msra.mxu0 %v1923_v7  ;;  %61 = vperm.xlu0 %1911, %v42_v18   ;;  %v1945_v36 = vld [vmem:[#allocation2 + $0xd4] ss:$8 sps:$4 sm:$0xff]   ;;  %v1980_v37 = vld [vmem:[#allocation2 + $0x130] ss:$8 sps:$4 sm:$0xff]   ;;  %v1984_v39 = vld [vmem:[#allocation2 + $0x124] ss:$8 sps:$4 sm:$0xff]  }
  0x1a   :  { %339 = vmatprep.subr.bf16.mxu0 %v1924_v8  ;;  %586 = vmatprep.subr.bf16.mxu1 %v1966_v22  ;;  %v1947_v38 = vld [vmem:[#allocation2 + $0xd0] ss:$8 sps:$4 sm:$0xff]   ;;  %v1948_v40 = vld [vmem:[#allocation2 + $0xc4] ss:$8 sps:$4 sm:$0xff]   ;;  %v1950_v41 = vld [vmem:[#allocation2 + $0xc0] ss:$8 sps:$4 sm:$0xff]  }
  0x1b   :  { %93 = vperm.xlu1 %1913, %v42_v18   ;;  %587 = vmatpush1.bf16.msra.mxu1 %v1968_v23  ;;  %v1986_v42 = vld [vmem:[#allocation2 + $0x120] ss:$8 sps:$4 sm:$0xff]   ;;  %v1990_v43 = vld [vmem:[#allocation2 + $0x114] ss:$8 sps:$4 sm:$0xff]   ;;  %v1953_v45 = vld [vmem:[#allocation2 + $0xb0] ss:$8 sps:$4 sm:$0xff]  }
  0x1c   :  { %588 = vmatprep.subr.bf16.mxu1 %v1969_v26  ;;  %v1951_v44 = vld [vmem:[#allocation2 + $0xb4] ss:$8 sps:$4 sm:$0xff]   ;;  %v1992_v46 = vld [vmem:[#allocation2 + $0x110] ss:$8 sps:$4 sm:$0xff]   ;;  %v1996_v47 = vld [vmem:[#allocation2 + $0x104] ss:$8 sps:$4 sm:$0xff]  }
  0x1d   :  { %340 = vmatpush1.bf16.msra.mxu0 %v1926_v9  ;;  %1914 = vset.pattern.permute.xlu0 %v2237_v28  ;;  %v1954_v48 = vld [vmem:[#allocation2 + $0xa4] ss:$8 sps:$4 sm:$0xff]   ;;  %v1956_v49 = vld [vmem:[#allocation2 + $0xa0] ss:$8 sps:$4 sm:$0xff]   ;;  %v2002_v51 = vld [vmem:[#allocation2 + $0x1f4] ss:$8 sps:$4 sm:$0xff]  }
  0x1e   :  { %341 = vmatprep.subr.bf16.mxu0 %v1927_v10  ;;  %v1998_v50 = vld [vmem:[#allocation2 + $0x100] ss:$8 sps:$4 sm:$0xff]   ;;  %v1957_v52 = vld [vmem:[#allocation2 + $0x94] ss:$8 sps:$4 sm:$0xff]   ;;  %v1959_v53 = vld [vmem:[#allocation2 + $0x90] ss:$8 sps:$4 sm:$0xff]  }
  0x1f   :  { %589 = vmatpush1.bf16.msra.mxu1 %v1971_v29  ;;  %v2004_v54 = vld [vmem:[#allocation2 + $0x1f0] ss:$8 sps:$4 sm:$0xff]   ;;  %v2008_v55 = vld [vmem:[#allocation2 + $0x1e4] ss:$8 sps:$4 sm:$0xff]   ;;  %v1962_v57 = vld [vmem:[#allocation2 + $0x80] ss:$8 sps:$4 sm:$0xff]  }
  0x20   :  { %590 = vmatprep.subr.bf16.mxu1 %v1972_v31  ;;  %v1960_v56 = vld [vmem:[#allocation2 + $0x84] ss:$8 sps:$4 sm:$0xff]   ;;  %v2010_v59 = vld [vmem:[#allocation2 + $0x1e0] ss:$8 sps:$4 sm:$0xff]   ;;  %v2014_v60 = vld [vmem:[#allocation2 + $0x1d4] ss:$8 sps:$4 sm:$0xff]  }
  0x21   :  { %342 = vmatpush1.bf16.msra.mxu0 %v1929_v11  ;;  %v124_v58 = vld [vmem:[%s2414_s1] sm:$0xff]  ;;  %v1977_v61 = vld [vmem:[#allocation2 + $0x274] ss:$8 sps:$4 sm:$0xff]   ;;  %v2016_v62 = vld [vmem:[#allocation2 + $0x1d0] ss:$8 sps:$4 sm:$0xff]   ;;  %vm2239_vm0 = vmmov 0  }
  0x22   :  { %343 = vmatprep.subr.bf16.mxu0 %v1930_v12  ;;  %v1975_v63 = vld [vmem:[#allocation2 + $0x270] ss:$8 sps:$4 sm:$0xff]   ;;  %v2020_v0 = vld [vmem:[#allocation2 + $0x1c4] ss:$8 sps:$4 sm:$0xff]   ;;  %v126_v1 = vpack.c.bf16 %v124_v58, %v124_v58  ;;  %v2022_v3 = vld [vmem:[#allocation2 + $0x1c0] ss:$8 sps:$4 sm:$0xff]  }
  0x23   :  { %591 = vmatpush1.bf16.msra.mxu1 %v1974_v33  ;;  %v1983_v2 = vld [vmem:[#allocation2 + $0x264] ss:$8 sps:$4 sm:$0xff]   ;;  %v1981_v4 = vld [vmem:[#allocation2 + $0x260] ss:$8 sps:$4 sm:$0xff]   ;;  %v2026_v5 = vld [vmem:[#allocation2 + $0x1b4] ss:$8 sps:$4 sm:$0xff]   ;;  %v50_v33 = vlaneseq }
  0x24   :  { %592 = vmatprep.subr.bf16.mxu1 %v1978_v35  ;;  %v1989_v6 = vld [vmem:[#allocation2 + $0x254] ss:$8 sps:$4 sm:$0xff]   ;;  %v2028_v7 = vld [vmem:[#allocation2 + $0x1b0] ss:$8 sps:$4 sm:$0xff]   ;;  %v2032_v9 = vld [vmem:[#allocation2 + $0x1a4] ss:$8 sps:$4 sm:$0xff]  }
  0x25   :  { %344 = vmatpush1.bf16.msra.mxu0 %v1932_v13  ;;  %v1987_v8 = vld [vmem:[#allocation2 + $0x250] ss:$8 sps:$4 sm:$0xff]   ;;  %v1995_v10 = vld [vmem:[#allocation2 + $0x244] ss:$8 sps:$4 sm:$0xff]   ;;  %v2034_v11 = vld [vmem:[#allocation2 + $0x1a0] ss:$8 sps:$4 sm:$0xff]  }
  0x26   :  { %345 = vmatprep.subr.bf16.mxu0 %v1933_v14  ;;  %v1993_v12 = vld [vmem:[#allocation2 + $0x240] ss:$8 sps:$4 sm:$0xff]   ;;  %v2038_v13 = vld [vmem:[#allocation2 + $0x194] ss:$8 sps:$4 sm:$0xff]   ;;  %v2007_v16 = vld [vmem:[#allocation2 + $0x224] ss:$8 sps:$4 sm:$0xff]  }
  0x27   :  { %593 = vmatpush1.bf16.msra.mxu1 %v1980_v37  ;;  %v2001_v14 = vld [vmem:[#allocation2 + $0x234] ss:$8 sps:$4 sm:$0xff]   ;;  %v2005_v17 = vld [vmem:[#allocation2 + $0x220] ss:$8 sps:$4 sm:$0xff]   ;;  %v2011_v19 = vld [vmem:[#allocation2 + $0x210] ss:$8 sps:$4 sm:$0xff]  }
  0x28   :  { %594 = vmatprep.subr.bf16.mxu1 %v1984_v39  ;;  %v2013_v18 = vld [vmem:[#allocation2 + $0x214] ss:$8 sps:$4 sm:$0xff]   ;;  %v2019_v20 = vld [vmem:[#allocation2 + $0x204] ss:$8 sps:$4 sm:$0xff]   ;;  %v2023_v23 = vld [vmem:[#allocation2 + $0x2f0] ss:$8 sps:$4 sm:$0xff]  }
  0x29   :  { %346 = vmatpush1.bf16.msra.mxu0 %v1935_v15  ;;  %v1999_v15 = vld [vmem:[#allocation2 + $0x230] ss:$8 sps:$4 sm:$0xff]   ;;  %v2025_v22 = vld [vmem:[#allocation2 + $0x2f4] ss:$8 sps:$4 sm:$0xff]   ;;  %v2029_v25 = vld [vmem:[#allocation2 + $0x2e0] ss:$8 sps:$4 sm:$0xff]  }
  0x2a   :  { %347 = vmatprep.subr.bf16.mxu0 %v1936_v21  ;;  %v2017_v21 = vld [vmem:[#allocation2 + $0x200] ss:$8 sps:$4 sm:$0xff]   ;;  %v2037_v26 = vld [vmem:[#allocation2 + $0x2d4] ss:$8 sps:$4 sm:$0xff]   ;;  %v2040_v28 = vld [vmem:[#allocation2 + $0x190] ss:$8 sps:$4 sm:$0xff]  }
  0x2b   :  { %595 = vmatpush1.bf16.msra.mxu1 %v1986_v42  ;;  %v2043_v29 = vld [vmem:[#allocation2 + $0x2c4] ss:$8 sps:$4 sm:$0xff]   ;;  %v2047_v35 = vld [vmem:[#allocation2 + $0x2b0] ss:$8 sps:$4 sm:$0xff]  }
  0x2c   :  { %596 = vmatprep.subr.bf16.mxu1 %v1990_v43  ;;  %v2044_v31 = vld [vmem:[#allocation2 + $0x184] ss:$8 sps:$4 sm:$0xff]   ;;  %v2053_v43 = vld [vmem:[#allocation2 + $0x290] ss:$8 sps:$4 sm:$0xff]  }
  0x2d   :  { %348 = vmatpush1.bf16.msra.mxu0 %v1938_v24  ;;  %v2031_v24 = vld [vmem:[#allocation2 + $0x2e4] ss:$8 sps:$4 sm:$0xff]  }
  0x2e   :  { %349 = vmatprep.subr.bf16.mxu0 %v1939_v27  ;;  %v2035_v27 = vld [vmem:[#allocation2 + $0x2d0] ss:$8 sps:$4 sm:$0xff]   ;;  %v2052_v37 = vld [vmem:[#allocation2 + $0x2a4] ss:$8 sps:$4 sm:$0xff]  }
  0x2f   :  { %597 = vmatpush1.bf16.msra.mxu1 %v1992_v46  ;;  %v44_v42 = vld [vmem:[%s2415_s2 + $0x8] sm:$0xff] }
  0x30   :  { %598 = vmatprep.subr.bf16.mxu1 %v1996_v47 }
  0x31   :  { %350 = vmatpush2.bf16.msra.mxu0 %v1941_v30  ;;  %v2041_v30 = vld [vmem:[#allocation2 + $0x2c0] ss:$8 sps:$4 sm:$0xff]  }
  0x32   :  { %351 = vmatprep.subr.bf16.mxu0 %v1942_v32  ;;  %v2046_v32 = vld [vmem:[#allocation2 + $0x180] ss:$8 sps:$4 sm:$0xff]  }
  0x33   :  { %599 = vmatpush1.bf16.msra.mxu1 %v1998_v50  ;;  %v2058_v50 = vld [vmem:[#allocation2 + $0x284] ss:$8 sps:$4 sm:$0xff]  }
  0x34   :  { %600 = vmatprep.subr.bf16.mxu1 %v2002_v51  ;;  %v2056_v51 = vld [vmem:[#allocation2 + $0x280] ss:$8 sps:$4 sm:$0xff]  }
  0x35   :  { %352 = vmatpush2.bf16.msra.mxu0 %v1944_v34  ;;  %v2049_v34 = vld [vmem:[#allocation2 + $0x2b4] ss:$8 sps:$4 sm:$0xff]  }
  0x36   :  { %353 = vmatprep.subr.bf16.mxu0 %v1945_v36  ;;  %v51_v36 = vshrl.u32 %v50_v33, 7  ;;  %v2109_v33 = vld [vmem:[#allocation2 + $0x414] ss:$8 sps:$4 sm:$0xff]  }
  0x37   :  { %601 = vmatpush2.bf16.msra.mxu1 %v2004_v54 }
  0x38   :  { %602 = vmatprep.subr.bf16.mxu1 %v2008_v55  ;;  %v2293_v39 = vsub.s32 0, %v51_v36 }
  0x39   :  { %354 = vmatpush2.bf16.msra.mxu0 %v1947_v38  ;;  %v2050_v38 = vld [vmem:[#allocation2 + $0x2a0] ss:$8 sps:$4 sm:$0xff]  }
  0x3a   :  { %355 = vmatprep.subr.bf16.mxu0 %v1948_v40  ;;  %v2055_v40 = vld [vmem:[#allocation2 + $0x294] ss:$8 sps:$4 sm:$0xff]   ;;  %v57_v47 = vrot.slane %v44_v42, %v2293_v39 }
  0x3b   :  { %603 = vmatpush2.bf16.msra.mxu1 %v2010_v59 }
  0x3c   :  { %604 = vmatprep.subr.bf16.mxu1 %v2014_v60 }
  0x3d   :  { %356 = vmatpush2.bf16.msra.mxu0 %v1950_v41  ;;  %v43_v41 = vld [vmem:[%s2415_s2] sm:$0xff] }
  0x3e   :  { %357 = vmatprep.subr.bf16.mxu0 %v1951_v44  ;;  %v82_v44 = vsub.s32 2, %v51_v36  ;;  %v53_v46 = vrot.slane %v43_v41, %v2293_v39 }
  0x3f   :  { %605 = vmatpush2.bf16.msra.mxu1 %v2016_v62 }
  0x40   :  { %606 = vmatprep.subr.bf16.mxu1 %v2020_v0 }
  0x41   :  { %358 = vmatpush2.bf16.msra.mxu0 %v1953_v45  ;;  %v2301_v45 = vsub.s32 1, %v51_v36 }
  0x42   :  { %359 = vmatprep.subr.bf16.mxu0 %v1954_v48 }
  0x43   :  { %607 = vmatpush2.bf16.msra.mxu1 %v2022_v3  ;;  %v67_v55 = vrot.slane %v43_v41, %v2301_v45  ;;  %v108_v3 = vld [vmem:[%s2419_s6] ss:$8 sm:$0x3] }
  0x44   :  { %608 = vmatprep.subr.bf16.mxu1 %v2026_v5 }
  0x45   :  { %360 = vmatpush2.bf16.msra.mxu0 %v1956_v49  ;;  %v98_v49 = vsub.s32 3, %v51_v36  ;;  %v2113_v36 = vld [vmem:[#allocation2 + $0x400] ss:$8 sps:$4 sm:$0xff]  }
  0x46   :  { %361 = vmatprep.subr.bf16.mxu0 %v1957_v52  ;;  %v83_v52 = vrot.slane %v43_v41, %v82_v44 }
  0x47   :  { %609 = vmatpush2.bf16.msra.mxu1 %v2028_v7  ;;  %v99_v59 = vrot.slane %v43_v41, %v98_v49  ;;  %v103_v60 = vrot.slane %v44_v42, %v98_v49  ;;  %v2125_v41 = vld [vmem:[#allocation2 + $0x4e0] ss:$8 sps:$4 sm:$0xff]  }
  0x48   :  { %610 = vmatprep.subr.bf16.mxu1 %v2032_v9  ;;  %v113_v9 = vrot.slane %v108_v3, %v2293_v39 }
  0x49   :  { %362 = vmatpush2.bf16.msra.mxu0 %v1959_v53  ;;  %v87_v53 = vrot.slane %v44_v42, %v82_v44  ;;  %v1661_v44 = vld [vmem:[%s2419_s6 + $0x1] ss:$8 sm:$0x3] }
  0x4a   :  { %363 = vmatprep.subr.bf16.mxu0 %v1960_v56  ;;  %v71_v56 = vrot.slane %v44_v42, %v2301_v45  ;;  %v2131_v42 = vld [vmem:[#allocation2 + $0x4d0] ss:$8 sps:$4 sm:$0xff]   ;;  %v166_v49 = vrot.slane %v1661_v44, %v2293_v39 }
  0x4b   :  { %611 = vmatpush2.bf16.msra.mxu1 %v2034_v11 }
  0x4c   :  { %612 = vmatprep.subr.bf16.mxu1 %v2038_v13 }
  0x4d   :  { %364 = vmatpush2.bf16.msra.mxu0 %v1962_v57 }
  0x4e   :  { %835 = vmatprep.subr.bf16.mxu0 %v1977_v61 }
  0x4f   :  { %613 = vmatpush2.bf16.msra.mxu1 %v2040_v28  ;;  %v2089_v28 = vld [vmem:[#allocation2 + $0x440] ss:$8 sps:$4 sm:$0xff]  }
  0x50   :  { %366 = vmatmul.mubr.bf16.vlgmr.msra.gmra.mxu0 %v126_v1  ;;  %614 = vmatprep.subr.bf16.mxu1 %v2044_v31  ;;  %v2103_v31 = vld [vmem:[#allocation2 + $0x424] ss:$8 sps:$4 sm:$0xff]  }
  0x51   :  { %836 = vmatpush1.bf16.msra.mxu0 %v1975_v63 }
  0x52   :  { %837 = vmatprep.subr.bf16.mxu0 %v1983_v2  ;;  %v2061_v2 = vld [vmem:[#allocation2 + $0x374] ss:$8 sps:$4 sm:$0xff]  }
  0x53   :  { %615 = vmatpush2.bf16.msra.mxu1 %v2046_v32  ;;  %v2101_v32 = vld [vmem:[#allocation2 + $0x420] ss:$8 sps:$4 sm:$0xff]  }
  0x55   :  { %838 = vmatpush1.bf16.msra.mxu0 %v1981_v4 }
  0x56   :  { %839 = vmatprep.subr.bf16.mxu0 %v1989_v6 }
  0x59   :  { %840 = vmatpush1.bf16.msra.mxu0 %v1987_v8 }
  0x5a   :  { %841 = vmatprep.subr.bf16.mxu0 %v1995_v10 }
  0x5d   :  { %842 = vmatpush1.bf16.msra.mxu0 %v1993_v12  ;;  %v117_v12 = vrot.slane %v108_v3, %v2301_v45  ;;  %v2067_v3 = vld [vmem:[#allocation2 + $0x354] ss:$8 sps:$4 sm:$0xff]  }
  0x5e   :  { %843 = vmatprep.subr.bf16.mxu0 %v2001_v14 }
  0x61   :  { %844 = vmatpush1.bf16.msra.mxu0 %v1999_v15 }
  0x62   :  { %845 = vmatprep.subr.bf16.mxu0 %v2007_v16 }
  0x65   :  { %846 = vmatpush1.bf16.msra.mxu0 %v2005_v17  ;;  %v2073_v17 = vld [vmem:[#allocation2 + $0x474] ss:$8 sps:$4 sm:$0xff]  }
  0x66   :  { %847 = vmatprep.subr.bf16.mxu0 %v2013_v18  ;;  %1108 = vmatprep.subr.bf16.mxu1 %v2073_v17  ;;  %v2106_v17 = vld [vmem:[#allocation2 + $0x3e4] ss:$8 sps:$4 sm:$0xff]  }
  0x69   :  { %848 = vmatpush1.bf16.msra.mxu0 %v2011_v19 }
  0x6a   :  { %849 = vmatprep.subr.bf16.mxu0 %v2019_v20 }
  0x6d   :  { %850 = vmatpush1.bf16.msra.mxu0 %v2017_v21 }
  0x6e   :  { %851 = vmatprep.subr.bf16.mxu0 %v2025_v22  ;;  %v2071_v22 = vld [vmem:[#allocation2 + $0x470] ss:$8 sps:$4 sm:$0xff]  }
  0x71   :  { %852 = vmatpush2.bf16.msra.mxu0 %v2023_v23  ;;  %v2079_v23 = vld [vmem:[#allocation2 + $0x464] ss:$8 sps:$4 sm:$0xff]  }
  0x72   :  { %853 = vmatprep.subr.bf16.mxu0 %v2031_v24  ;;  %v2077_v24 = vld [vmem:[#allocation2 + $0x460] ss:$8 sps:$4 sm:$0xff]  }
  0x75   :  { %854 = vmatpush2.bf16.msra.mxu0 %v2029_v25  ;;  %v2085_v25 = vld [vmem:[#allocation2 + $0x454] ss:$8 sps:$4 sm:$0xff]  }
  0x76   :  { %855 = vmatprep.subr.bf16.mxu0 %v2037_v26  ;;  %v2083_v26 = vld [vmem:[#allocation2 + $0x450] ss:$8 sps:$4 sm:$0xff]  }
  0x79   :  { %856 = vmatpush2.bf16.msra.mxu0 %v2035_v27  ;;  %v2091_v27 = vld [vmem:[#allocation2 + $0x444] ss:$8 sps:$4 sm:$0xff]  }
  0x7a   :  { %857 = vmatprep.subr.bf16.mxu0 %v2043_v29  ;;  %v2097_v29 = vld [vmem:[#allocation2 + $0x434] ss:$8 sps:$4 sm:$0xff]  }
  0x7d   :  { %858 = vmatpush2.bf16.msra.mxu0 %v2041_v30  ;;  %v2095_v30 = vld [vmem:[#allocation2 + $0x430] ss:$8 sps:$4 sm:$0xff]  }
  0x7e   :  { %859 = vmatprep.subr.bf16.mxu0 %v2049_v34  ;;  %v2107_v34 = vld [vmem:[#allocation2 + $0x410] ss:$8 sps:$4 sm:$0xff]  }
  0x81   :  { %860 = vmatpush2.bf16.msra.mxu0 %v2047_v35  ;;  %v2115_v35 = vld [vmem:[#allocation2 + $0x404] ss:$8 sps:$4 sm:$0xff]  }
  0x82   :  { %861 = vmatprep.subr.bf16.mxu0 %v2052_v37  ;;  %v2121_v37 = vld [vmem:[#allocation2 + $0x4f4] ss:$8 sps:$4 sm:$0xff]  }
  0x85   :  { %862 = vmatpush2.bf16.msra.mxu0 %v2050_v38  ;;  %v2119_v38 = vld [vmem:[#allocation2 + $0x4f0] ss:$8 sps:$4 sm:$0xff]  }
  0x86   :  { %863 = vmatprep.subr.bf16.mxu0 %v2055_v40  ;;  %v2127_v40 = vld [vmem:[#allocation2 + $0x4e4] ss:$8 sps:$4 sm:$0xff]  }
  0x89   :  { %864 = vmatpush2.bf16.msra.mxu0 %v2053_v43  ;;  %v2133_v43 = vld [vmem:[#allocation2 + $0x4d4] ss:$8 sps:$4 sm:$0xff]  }
  0x8a   :  { %865 = vmatprep.subr.bf16.mxu0 %v2058_v50  ;;  %v2143_v50 = vld [vmem:[#allocation2 + $0x4b0] ss:$8 sps:$4 sm:$0xff]  }
  0x8d   :  { %866 = vmatpush2.bf16.msra.mxu0 %v2056_v51  ;;  %v170_v51 = vrot.slane %v1661_v44, %v2301_v45 }
  0x8e   :  { %1309 = vmatprep.subr.bf16.mxu0 %v2061_v2  ;;  %v2062_v2 = vld [vmem:[#allocation2 + $0x360] ss:$8 sps:$4 sm:$0xff]  }
  0x8f   :  { %v48_v48 = vpop.permute.xlu0 %47  ;;  %v78_v54 = vpop.permute.xlu1 %77 }
  0x90   :  { %v58_v57 = vmul.f32 %v53_v46, %v48_v48  ;;  %v59_v58 = vmul.f32 %v57_v47, %v48_v48  ;;  %v88_v62 = vmul.f32 %v83_v52, %v78_v54  ;;  %v89_v63 = vmul.f32 %v87_v53, %v78_v54  ;;  %v2137_v46 = vld [vmem:[#allocation2 + $0x4c0] ss:$8 sps:$4 sm:$0xff]   ;;  %v2139_v47 = vld [vmem:[#allocation2 + $0x4c4] ss:$8 sps:$4 sm:$0xff]   ;;  %v2145_v48 = vld [vmem:[#allocation2 + $0x4b4] ss:$8 sps:$4 sm:$0xff]  }
  0x91   :  { %v2148_v52 = vld [vmem:[#allocation2 + $0x4a4] ss:$8 sps:$4 sm:$0xff]  }
  0x94   :  { %v62_v61 = vpop.permute.xlu0 %61 }
  0x95   :  { %v72_v0 = vmul.f32 %v67_v55, %v62_v61  ;;  %v73_v1 = vmul.f32 %v71_v56, %v62_v61  ;;  %v2146_v56 = vld [vmem:[#allocation2 + $0x4a0] ss:$8 sps:$4 sm:$0xff]  }
  0x96   :  { %v94_v4 = vpop.permute.xlu1 %93 }
  0x97   :  { %v74_v5 = vadd.f32 %v72_v0, %v58_v57  ;;  %v75_v6 = vadd.f32 %v73_v1, %v59_v58  ;;  %v104_v7 = vmul.f32 %v99_v59, %v94_v4  ;;  %v105_v8 = vmul.f32 %v103_v60, %v94_v4  ;;  %v2064_v1 = vld [vmem:[#allocation2 + $0x364] ss:$8 sps:$4 sm:$0xff]   ;;  %v2065_v4 = vld [vmem:[#allocation2 + $0x350] ss:$8 sps:$4 sm:$0xff]  }
  0x99   :  { %v90_v10 = vadd.f32 %v88_v62, %v74_v5  ;;  %v91_v11 = vadd.f32 %v89_v63, %v75_v6  ;;  %v2059_v63 = vld [vmem:[#allocation2 + $0x370] ss:$8 sps:$4 sm:$0xff]   ;;  %v2070_v5 = vld [vmem:[#allocation2 + $0x344] ss:$8 sps:$4 sm:$0xff]   ;;  %v2068_v6 = vld [vmem:[#allocation2 + $0x340] ss:$8 sps:$4 sm:$0xff]  }
  0x9b   :  { %v106_v13 = vadd.f32 %v104_v7, %v90_v10  ;;  %v107_v14 = vadd.f32 %v105_v8, %v91_v11  ;;  %v2076_v7 = vld [vmem:[#allocation2 + $0x334] ss:$8 sps:$4 sm:$0xff]   ;;  %v2074_v8 = vld [vmem:[#allocation2 + $0x330] ss:$8 sps:$4 sm:$0xff]   ;;  %v2080_v10 = vld [vmem:[#allocation2 + $0x320] ss:$8 sps:$4 sm:$0xff]  }
  0x9c   :  { %v2088_v11 = vld [vmem:[#allocation2 + $0x314] ss:$8 sps:$4 sm:$0xff]  }
  0x9d   :  { %v120_v15 = vadd.f32 %v113_v9, %v106_v13  ;;  %v121_v16 = vadd.f32 %v117_v12, %v107_v14  ;;  %v2082_v9 = vld [vmem:[#allocation2 + $0x324] ss:$8 sps:$4 sm:$0xff]   ;;  %v2086_v12 = vld [vmem:[#allocation2 + $0x310] ss:$8 sps:$4 sm:$0xff]   ;;  %v2092_v14 = vld [vmem:[#allocation2 + $0x300] ss:$8 sps:$4 sm:$0xff]  }
  0x9e   :  { %v2094_v13 = vld [vmem:[#allocation2 + $0x304] ss:$8 sps:$4 sm:$0xff]  }
  0x9f   :  { %2179 = vtanh.f32 %v120_v15  ;;  %v2100_v15 = vld [vmem:[#allocation2 + $0x3f4] ss:$8 sps:$4 sm:$0xff]  }
  0xa0   :  { %2181 = vtanh.f32 %v121_v16  ;;  %v2098_v16 = vld [vmem:[#allocation2 + $0x3f0] ss:$8 sps:$4 sm:$0xff]  }
  0xac   :  { %v2180_v18 = vpop.eup %2179 }
  0xad   :  { %v2182_v19 = vpop.eup %2181  ;;  %v376_v20 = vpack.c.bf16 %v2180_v18, %v2180_v18  ;;  %v2104_v18 = vld [vmem:[#allocation2 + $0x3e0] ss:$8 sps:$4 sm:$0xff]  }
  0xae   :  { %v377_v21 = vpack.c.bf16 %v2182_v19, %v2182_v19  ;;  %v2112_v19 = vld [vmem:[#allocation2 + $0x3d4] ss:$8 sps:$4 sm:$0xff]  }
  0xb0   :  { %616 = vmatprep.mubr.bf16.mxu1 %v377_v21  ;;  %v2118_v21 = vld [vmem:[#allocation2 + $0x3c4] ss:$8 sps:$4 sm:$0xff]  }
  0xb1   :  { %617 = vmatmul.mubr.bf16.vlgmr.msra.gmra.mxu1 %v376_v20  ;;  %v2110_v20 = vld [vmem:[#allocation2 + $0x3d0] ss:$8 sps:$4 sm:$0xff]  }
  0xb2   :  { %1109 = vmatpush1.bf16.msra.mxu1 %v2071_v22  ;;  %v2116_v22 = vld [vmem:[#allocation2 + $0x3c0] ss:$8 sps:$4 sm:$0xff]  }
  0xb3   :  { %1110 = vmatprep.subr.bf16.mxu1 %v2079_v23  ;;  %v2124_v23 = vld [vmem:[#allocation2 + $0x3b4] ss:$8 sps:$4 sm:$0xff]  }
  0xb6   :  { %1111 = vmatpush1.bf16.msra.mxu1 %v2077_v24  ;;  %v2122_v24 = vld [vmem:[#allocation2 + $0x3b0] ss:$8 sps:$4 sm:$0xff]  }
  0xb7   :  { %1112 = vmatprep.subr.bf16.mxu1 %v2085_v25  ;;  %v2130_v25 = vld [vmem:[#allocation2 + $0x3a4] ss:$8 sps:$4 sm:$0xff]  }
  0xba   :  { %1113 = vmatpush1.bf16.msra.mxu1 %v2083_v26  ;;  %v2128_v26 = vld [vmem:[#allocation2 + $0x3a0] ss:$8 sps:$4 sm:$0xff]  }
  0xbb   :  { %1114 = vmatprep.subr.bf16.mxu1 %v2091_v27  ;;  %v2136_v27 = vld [vmem:[#allocation2 + $0x394] ss:$8 sps:$4 sm:$0xff]  }
  0xbe   :  { %1115 = vmatpush1.bf16.msra.mxu1 %v2089_v28  ;;  %v2134_v28 = vld [vmem:[#allocation2 + $0x390] ss:$8 sps:$4 sm:$0xff]  }
  0xbf   :  { %1116 = vmatprep.subr.bf16.mxu1 %v2097_v29  ;;  %v2142_v29 = vld [vmem:[#allocation2 + $0x384] ss:$8 sps:$4 sm:$0xff]  }
  0xc2   :  { %1117 = vmatpush1.bf16.msra.mxu1 %v2095_v30  ;;  %v2140_v30 = vld [vmem:[#allocation2 + $0x380] ss:$8 sps:$4 sm:$0xff]  }
  0xc3   :  { %1118 = vmatprep.subr.bf16.mxu1 %v2103_v31  ;;  %v2151_v31 = vld [vmem:[#allocation2 + $0x494] ss:$8 sps:$4 sm:$0xff]  }
  0xc6   :  { %1119 = vmatpush1.bf16.msra.mxu1 %v2101_v32  ;;  %v2149_v32 = vld [vmem:[#allocation2 + $0x490] ss:$8 sps:$4 sm:$0xff]  }
  0xc7   :  { %1120 = vmatprep.subr.bf16.mxu1 %v2109_v33  ;;  %v2154_v33 = vld [vmem:[#allocation2 + $0x484] ss:$8 sps:$4 sm:$0xff]  }
  0xca   :  { %1121 = vmatpush1.bf16.msra.mxu1 %v2107_v34  ;;  %v2152_v34 = vld [vmem:[#allocation2 + $0x480] ss:$8 sps:$4 sm:$0xff]  }
  0xcb   :  { %1122 = vmatprep.subr.bf16.mxu1 %v2115_v35  ;;  %v2155_v35 = vld [vmem:[%s2417_s4 + $0x78] sm:$0xff]  }
  0xce   :  { %1123 = vmatpush1.bf16.msra.mxu1 %v2113_v36  ;;  %v1694_v36 = vld [vmem:[%s2419_s6 + $0x2] ss:$8 sm:$0x3] }
  0xcf   :  { %1124 = vmatprep.subr.bf16.mxu1 %v2121_v37  ;;  %v417_v37 = vrot.slane %v1694_v36, %v2293_v39 }
  0xd2   :  { %1125 = vmatpush2.bf16.msra.mxu1 %v2119_v38  ;;  %v421_v38 = vrot.slane %v1694_v36, %v2301_v45  ;;  %v2174_v36 = vld [vmem:[%s2418_s5 + $0x20] sm:$0xff]  }
  0xd3   :  { %1126 = vmatprep.subr.bf16.mxu1 %v2127_v40 }
  0xd6   :  { %1127 = vmatpush2.bf16.msra.mxu1 %v2125_v41 }
  0xd7   :  { %1128 = vmatprep.subr.bf16.mxu1 %v2133_v43 }
  0xda   :  { %1129 = vmatpush2.bf16.msra.mxu1 %v2131_v42 }
  0xdb   :  { %1130 = vmatprep.subr.bf16.mxu1 %v2139_v47 }
  0xde   :  { %1131 = vmatpush2.bf16.msra.mxu1 %v2137_v46 }
  0xdf   :  { %1132 = vmatprep.subr.bf16.mxu1 %v2145_v48 }
  0xe2   :  { %1133 = vmatpush2.bf16.msra.mxu1 %v2143_v50 }
  0xe3   :  { %1134 = vmatprep.subr.bf16.mxu1 %v2148_v52 }
  0xe6   :  { %1135 = vmatpush2.bf16.msra.mxu1 %v2146_v56 }
  0xe7   :  { %1136 = vmatprep.subr.bf16.mxu1 %v2151_v31 }
  0xea   :  { %1137 = vmatpush2.bf16.msra.mxu1 %v2149_v32 }
  0xeb   :  { %1138 = vmatprep.subr.bf16.mxu1 %v2154_v33 }
  0xee   :  { %1139 = vmatpush2.bf16.msra.mxu1 %v2152_v34  ;;  %v2171_v34 = vld [vmem:[%s2418_s5 + $0x38] sm:$0xff]  }
  0xef   :  { %1849 = vmatprep.subr.bf16.mxu1 %v2155_v35 }
 0x110   :  { %v367_v53 = vpop.f32.mrf.mxu0 }
 0x111   :  { %v368_v54 = vadd.f32 %v367_v53, %v166_v49 }
 0x112   :  { %v369_v55 = vpop.f32.mrf.mxu0 }
 0x113   :  { %v370_v57 = vadd.f32 %v369_v55, %v170_v51  ;;  %2183 = vtanh.f32 %v368_v54  ;;  %v1727_v51 = vld [vmem:[%s2419_s6 + $0x3] ss:$8 sm:$0x3] }
 0x114   :  { %v371_v58 = vpop.f32.mrf.mxu0  ;;  %v668_v52 = vrot.slane %v1727_v51, %v2293_v39  ;;  %v672_v53 = vrot.slane %v1727_v51, %v2301_v45 }
 0x115   :  { %2185 = vtanh.f32 %v370_v57 }
 0x116   :  { %v372_v59 = vpop.f32.mrf.mxu0 }
 0x120   :  { %v2184_v60 = vpop.eup %2183 }
 0x121   :  { %v627_v0 = vpack.c.bf16 %v2184_v60, %v2184_v60 }
 0x122   :  { %v2186_v61 = vpop.eup %2185 }
 0x123   :  { %v628_v62 = vpack.c.bf16 %v2186_v61, %v2186_v61 }
 0x125   :  { %867 = vmatprep.mubr.bf16.mxu0 %v628_v62 }
 0x126   :  { %868 = vmatmul.mubr.bf16.vlgmr.msra.gmra.mxu0 %v627_v0 }
 0x127   :  { %1310 = vmatpush1.bf16.msra.mxu0 %v2059_v63  ;;  %v2156_v63 = vld [vmem:[%s2417_s4 + $0x38] sm:$0xff]  }
 0x128   :  { %1311 = vmatprep.subr.bf16.mxu0 %v2064_v1  ;;  %v2157_v1 = vld [vmem:[%s2417_s4 + $0x70] sm:$0xff]  }
 0x12b   :  { %1312 = vmatpush1.bf16.msra.mxu0 %v2062_v2  ;;  %v2158_v2 = vld [vmem:[%s2417_s4 + $0x30] sm:$0xff]  }
 0x12c   :  { %1313 = vmatprep.subr.bf16.mxu0 %v2067_v3  ;;  %v2159_v3 = vld [vmem:[%s2417_s4 + $0x68] sm:$0xff]  }
 0x12f   :  { %1314 = vmatpush1.bf16.msra.mxu0 %v2065_v4  ;;  %v2160_v4 = vld [vmem:[%s2417_s4 + $0x28] sm:$0xff]  }
 0x130   :  { %1315 = vmatprep.subr.bf16.mxu0 %v2070_v5  ;;  %v2161_v5 = vld [vmem:[%s2417_s4 + $0x60] sm:$0xff]  }
 0x133   :  { %1316 = vmatpush1.bf16.msra.mxu0 %v2068_v6  ;;  %v2162_v6 = vld [vmem:[%s2417_s4 + $0x20] sm:$0xff]  }
 0x134   :  { %1317 = vmatprep.subr.bf16.mxu0 %v2076_v7  ;;  %v2163_v7 = vld [vmem:[%s2417_s4 + $0x58] sm:$0xff]  }
 0x137   :  { %1318 = vmatpush1.bf16.msra.mxu0 %v2074_v8  ;;  %v2164_v8 = vld [vmem:[%s2417_s4 + $0x18] sm:$0xff]  }
 0x138   :  { %1319 = vmatprep.subr.bf16.mxu0 %v2082_v9  ;;  %v2165_v9 = vld [vmem:[%s2417_s4 + $0x50] sm:$0xff]  }
 0x13b   :  { %1320 = vmatpush1.bf16.msra.mxu0 %v2080_v10  ;;  %v2166_v10 = vld [vmem:[%s2417_s4 + $0x10] sm:$0xff]  }
 0x13c   :  { %1321 = vmatprep.subr.bf16.mxu0 %v2088_v11  ;;  %v2167_v11 = vld [vmem:[%s2417_s4 + $0x48] sm:$0xff]  }
 0x13f   :  { %1322 = vmatpush1.bf16.msra.mxu0 %v2086_v12  ;;  %v2168_v12 = vld [vmem:[%s2417_s4 + $0x8] sm:$0xff]  }
 0x140   :  { %1323 = vmatprep.subr.bf16.mxu0 %v2094_v13  ;;  %v2169_v13 = vld [vmem:[%s2417_s4 + $0x40] sm:$0xff]  }
 0x143   :  { %1324 = vmatpush1.bf16.msra.mxu0 %v2092_v14  ;;  %v2170_v14 = vld [vmem:[%s2417_s4] sm:$0xff]  }
 0x144   :  { %1325 = vmatprep.subr.bf16.mxu0 %v2100_v15  ;;  %v2238_v15 = vmov 0.0  }
 0x147   :  { %1326 = vmatpush2.bf16.msra.mxu0 %v2098_v16 }
 0x148   :  { %1327 = vmatprep.subr.bf16.mxu0 %v2106_v17 }
 0x14b   :  { %1328 = vmatpush2.bf16.msra.mxu0 %v2104_v18 }
 0x14c   :  { %1329 = vmatprep.subr.bf16.mxu0 %v2112_v19 }
 0x14f   :  { %1330 = vmatpush2.bf16.msra.mxu0 %v2110_v20  ;;  %v1824_v20 = vld [vmem:[%s2419_s6 + $0x4] ss:$8 sm:$0x3] }
 0x150   :  { %1331 = vmatprep.subr.bf16.mxu0 %v2118_v21  ;;  %v1356_v21 = vrot.slane %v1824_v20, %v2293_v39  ;;  %v2172_v39 = vld [vmem:[%s2418_s5 + $0x30] sm:$0xff]  }
 0x153   :  { %1332 = vmatpush2.bf16.msra.mxu0 %v2116_v22 }
 0x154   :  { %1333 = vmatprep.subr.bf16.mxu0 %v2124_v23 }
 0x157   :  { %1334 = vmatpush2.bf16.msra.mxu0 %v2122_v24  ;;  %v1360_v24 = vrot.slane %v1824_v20, %v2301_v45  ;;  %v2173_v45 = vld [vmem:[%s2418_s5 + $0x28] sm:$0xff]  }
 0x158   :  { %1335 = vmatprep.subr.bf16.mxu0 %v2130_v25 }
 0x15b   :  { %1336 = vmatpush2.bf16.msra.mxu0 %v2128_v26 }
 0x15c   :  { %1337 = vmatprep.subr.bf16.mxu0 %v2136_v27 }
 0x15f   :  { %1338 = vmatpush2.bf16.msra.mxu0 %v2134_v28 }
 0x160   :  { %1339 = vmatprep.subr.bf16.mxu0 %v2142_v29 }
 0x163   :  { %1340 = vmatpush2.bf16.msra.mxu0 %v2140_v30 }
 0x171   :  { %v618_v40 = vpop.f32.mrf.mxu1 }
 0x172   :  { %v619_v41 = vadd.f32 %v618_v40, %v417_v37  ;;  %v2175_v37 = vld [vmem:[%s2418_s5 + $0x18] sm:$0xff]   ;;  %v2177_v40 = vld [vmem:[%s2418_s5 + $0x8] sm:$0xff]  }
 0x173   :  { %v620_v42 = vpop.f32.mrf.mxu1 }
 0x174   :  { %v625_v43 = vmax.f32 %v619_v41, 0.0  ;;  %v621_v44 = vadd.f32 %v620_v42, %v421_v38  ;;  %v2176_v38 = vld [vmem:[%s2418_s5 + $0x10] sm:$0xff]   ;;  %v2178_v41 = vld [vmem:[%s2418_s5] sm:$0xff]   ;;  %s2240_s5 = smov [#allocation5]  }
 0x175   :  { %v622_v46 = vpop.f32.mrf.mxu1  ;;  %s1652_s21 = sshll.u32 %s2240_s5, 4  ;;  %s1653_s21 = int_to_ptr.vmem [resolvable:$true] %s1652_s21 }
 0x176   :  { %v626_v47 = vmax.f32 %v621_v44, 0.0  ;;  %v878_v48 = vpack.c.bf16 %v625_v43, %v625_v43  ;;  %v1401_v43 = vld [vmem:[%s2419_s6 + $0x5] ss:$0 sm:$0xff]  ;;  %s2207_s22 = scalar_lea.vmem %s1653_s21, 128  ;;  %p2212_p6 = scmp.lt.s32.totalorder %s1653_s21, %s1653_s21 }
 0x177   :  { %v623_v49 = vpop.f32.mrf.mxu1  ;;  %p2208_p5 = scmp.ne.s32.totalorder %s1653_s21, %s2207_s22  ;;  %p2213_p7 = scmp.lt.s32.totalorder %s2207_s22, %s2207_s22 }
 0x178   :  { %v879_v50 = vpack.c.bf16 %v626_v47, %v626_v47 }
 0x179   :  { %p2214_p8 = por %p2213_p7, %p2212_p6 }
 0x17a   :  { %1341 = vmatprep.mubr.bf16.mxu0 %v879_v50 }
 0x17b   :  { %1342 = vmatmul.mubr.bf16.vlgmr.msra.gmra.mxu0 %v878_v48  ;;  %p2215_p9 = pnand %p2214_p8, %p2208_p5 }
 0x1e6   :  { %v869_v54 = vpop.f32.mrf.mxu0 }
 0x1e7   :  { %v870_v55 = vadd.f32 %v869_v54, %v668_v52  ;;  %v1556_v52 = vld [vmem:[%s2419_s6 + $0x6] ss:$0 sm:$0xff] }
 0x1e8   :  { %v871_v56 = vpop.f32.mrf.mxu0 }
 0x1e9   :  { %v872_v57 = vadd.f32 %v871_v56, %v672_v53  ;;  %v876_v58 = vmax.f32 %v870_v55, 0.0 }
 0x1ea   :  { %v873_v59 = vpop.f32.mrf.mxu0 }
 0x1eb   :  { %v877_v60 = vmax.f32 %v872_v57, 0.0  ;;  %v913_v0 = vpack.c.bf16 %v876_v58, %v876_v58 }
 0x1ec   :  { %v874_v61 = vpop.f32.mrf.mxu0 }
 0x1ed   :  { %v914_v62 = vpack.c.bf16 %v877_v60, %v877_v60 }
 0x1ef   :  { %1140 = vmatprep.mubr.bf16.mxu1 %v914_v62 }
 0x1f0   :  { %1141 = vmatmul.mubr.bf16.vlgmr.msra.gmra.mxu1 %v913_v0 }
 0x1f1   :  { %1850 = vmatpush3.bf16.msra.mxu1 %v2156_v63 }
 0x1f2   :  { %1851 = vmatprep.subr.bf16.mxu1 %v2157_v1 }
 0x1f5   :  { %1852 = vmatpush3.bf16.msra.mxu1 %v2158_v2 }
 0x1f6   :  { %1853 = vmatprep.subr.bf16.mxu1 %v2159_v3 }
 0x1f9   :  { %1854 = vmatpush3.bf16.msra.mxu1 %v2160_v4 }
 0x1fa   :  { %1855 = vmatprep.subr.bf16.mxu1 %v2161_v5 }
 0x1fd   :  { %1856 = vmatpush3.bf16.msra.mxu1 %v2162_v6 }
 0x1fe   :  { %1857 = vmatprep.subr.bf16.mxu1 %v2163_v7 }
 0x201   :  { %1858 = vmatpush3.bf16.msra.mxu1 %v2164_v8 }
 0x202   :  { %1859 = vmatprep.subr.bf16.mxu1 %v2165_v9 }
 0x205   :  { %1860 = vmatpush3.bf16.msra.mxu1 %v2166_v10 }
 0x206   :  { %1861 = vmatprep.subr.bf16.mxu1 %v2167_v11 }
 0x209   :  { %1862 = vmatpush3.bf16.msra.mxu1 %v2168_v12 }
 0x20a   :  { %1863 = vmatprep.subr.bf16.mxu1 %v2169_v13 }
 0x20d   :  { %1864 = vmatpush3.bf16.msra.mxu1 %v2170_v14 }
 0x20e   :  { %1880 = vmatprep.subr.bf16.mxu1 %v2238_v15 }
 0x23b   :  { %v1343_v16 = vpop.f32.mrf.mxu0 }
 0x23d   :  { %v1345_v17 = vpop.f32.mrf.mxu0 }
 0x23f   :  { %v1347_v18 = vpop.f32.mrf.mxu0 }
 0x241   :  { %v1348_v19 = vpop.f32.mrf.mxu0 }
 0x2b0   :  { %v1142_v22 = vpop.f32.mrf.mxu1 }
 0x2b1   :  { %v1344_v23 = vadd.f32 %v1343_v16, %v1142_v22 }
 0x2b2   :  { %v1144_v25 = vpop.f32.mrf.mxu1 }
 0x2b3   :  { %v1363_v26 = vadd.f32 %v1356_v21, %v1344_v23  ;;  %v1346_v27 = vadd.f32 %v1345_v17, %v1144_v25 }
 0x2b4   :  { %v1146_v28 = vpop.f32.mrf.mxu1 }
 0x2b5   :  { %v1364_v29 = vadd.f32 %v1360_v24, %v1346_v27  ;;  %v1365_v30 = vmax.f32 %v1363_v26, 0.0 }
 0x2b6   :  { %v1147_v31 = vpop.f32.mrf.mxu1 }
 0x2b7   :  { %v1366_v32 = vmax.f32 %v1364_v29, 0.0  ;;  %v1367_v35 = vpack.c.bf16 %v1365_v30, %v1365_v30 }
 0x2b9   :  { %v1368_v33 = vpack.c.bf16 %v1366_v32, %v1366_v32 }
 0x2bb   :  { %1530 = vmatprep.mubr.bf16.mxu1 %v1368_v33 }
 0x2bc   :  { %1531 = vmatmul.mubr.bf16.vlgmr.msra.gmra.mxu1 %v1367_v35 }
 0x2bd   :  { %1881 = vmatpush3.bf16.msra.mxu1 %v2171_v34  ;;  %1896 = vmatprep.mubr.msk.bf16.mxu1 %vm2239_vm0, %v2238_v15 }
 0x2be   :  { %1882 = vmatprep.subr.bf16.mxu1 %v2238_v15 }
 0x2c1   :  { %1883 = vmatpush3.bf16.msra.mxu1 %v2172_v39 }
 0x2c2   :  { %1884 = vmatprep.subr.bf16.mxu1 %v2238_v15 }
 0x2c5   :  { %1885 = vmatpush3.bf16.msra.mxu1 %v2173_v45 }
 0x2c6   :  { %1886 = vmatprep.subr.bf16.mxu1 %v2238_v15 }
 0x2c9   :  { %1887 = vmatpush3.bf16.msra.mxu1 %v2174_v36 }
 0x2ca   :  { %1888 = vmatprep.subr.bf16.mxu1 %v2238_v15 }
 0x2cd   :  { %1889 = vmatpush3.bf16.msra.mxu1 %v2175_v37 }
 0x2ce   :  { %1890 = vmatprep.subr.bf16.mxu1 %v2238_v15 }
 0x2d1   :  { %1891 = vmatpush3.bf16.msra.mxu1 %v2176_v38 }
 0x2d2   :  { %1892 = vmatprep.subr.bf16.mxu1 %v2238_v15 }
 0x2d5   :  { %1893 = vmatpush3.bf16.msra.mxu1 %v2177_v40 }
 0x2d6   :  { %1894 = vmatprep.subr.bf16.mxu1 %v2238_v15 }
 0x2d9   :  { %1895 = vmatpush3.bf16.msra.mxu1 %v2178_v41 }
 0x37c   :  { %v1865_v42 = vpop.f32.mrf.mxu1 }
 0x37e   :  { %v1866_v44 = vpop.f32.mrf.mxu1 }
 0x37f   :  { %v1867_v46 = vadd.f32 %v1866_v44, %v1865_v42 }
 0x380   :  { %v1868_v47 = vpop.f32.mrf.mxu1 }
 0x381   :  { %v1533_v48 = vadd.f32 %v1867_v46, %v1401_v43 }
 0x382   :  { %v1869_v49 = vpop.f32.mrf.mxu1 }
 0x383   :  { %v1538_v50 = vmax.f32 %v1533_v48, 0.0 }
 0x385   :  { %v1539_v51 = vpack.c.bf16 %v1538_v50, %v1538_v50 }
 0x387   :  { %1897 = vmatmul.mubr.bf16.vlgmr.msra.gmra.mxu1 %v1539_v51 }
 0x447   :  { %v1639_v53 = vpop.f32.mrf.mxu1 }
 0x448   :  { %v1640_v54 = vadd.f32 %v1639_v53, %v1556_v52 }
 0x449   :  { %v1898_v55 = vpop.f32.mrf.mxu1 }
 0x44a   :  { %1645 = vst [vmem:[#allocation5] sm:$0xff] %v1640_v54 }
 0x44b   :  { %v1642_v56 = vpop.f32.mrf.mxu1 }
 0x44c   :  { %2218 = shalt.err (!%p2215_p9)
}
 0x44d   :  { %1655 = dma.vmem_to_hbm [thread:$0]  %s1653_s21, 128, %s2420_s7, [#allocation4]   ;;  %v1899_v57 = vpop.f32.mrf.mxu1 }
 0x44e   :  { %2229 = dma.done.wait [#allocation4], 128  }
 0x44f   :  { %2230 = vsyncadd [#allocation4], 4294967168 }
 0x450   :  { %1659 = vsyncpa [#allocation3], 1 }
 0x451   :  { %1660 = vsyncpa [#allocation4], 1 }

</bundles_post_ra>
